<compile_context>
chip_gen: v6e
topology: v6e:2x2x1
jax: 0.10.0
libtpu: 0.0.40
codegen_flags: <defaults>
</compile_context>

<pallas_src>
import functools

import jax
import jax.numpy as jnp
from jax.experimental import pallas as pl
from jax.experimental.pallas import tpu as pltpu


def prelstm_kernel(x2d_ref, wih_ref, whh_ref, b_ref, wfc_ref, bfc_ref,
                   out_ref, gx_scr, *, T, Bp, H):
    G = 4 * H

    # ---- Phase 1: hoisted input projection --------------------------------
    # One matmul for all time steps: (T*Bp, D) @ (D, 4H) + b, stored time-major
    # in a 3-D scratch so the per-step read is a full-tile leading-axis index.
    gx = (jnp.dot(x2d_ref[...], wih_ref[...],
                  preferred_element_type=jnp.float32)
          + b_ref[...])
    gx_scr[...] = gx.reshape(T, Bp, G)

    whh = whh_ref[...]  # (H, 4H) stays resident for the whole recurrence.

    # Lane mask selecting the 'g' gate lanes; hoisted out of the loop (JAX
    # does not CSE broadcast_in_dim).
    lane = jax.lax.broadcasted_iota(jnp.int32, (Bp, G), 1)
    is_g = (lane >= 2 * H) & (lane < 3 * H)

    # ---- Phase 2: serial recurrence (only h @ W_hh on the critical path) --
    def step(t, carry):
        h, c = carry
        gates = gx_scr[t] + jnp.dot(h, whh, preferred_element_type=jnp.float32)
        # Full-vreg EUP calls (one sigmoid + one tanh over all 128 lanes),
        # then a single lane-select instead of four narrow transcendentals.
        act = jnp.where(is_g, jnp.tanh(gates), jax.nn.sigmoid(gates))
        i = act[:, 0 * H:1 * H]
        f = act[:, 1 * H:2 * H]
        g = act[:, 2 * H:3 * H]
        o = act[:, 3 * H:4 * H]
        c_new = f * c + i * g
        h_new = o * jnp.tanh(c_new)
        return h_new, c_new

    h0 = jnp.zeros((Bp, H), jnp.float32)
    c0 = jnp.zeros((Bp, H), jnp.float32)
    h_T, _ = jax.lax.fori_loop(0, T, step, (h0, c0), unroll=min(T, 8))

    # ---- Phase 3: collapsed fc1->fc2->fc3 (single matmul, folded weights) --
    out_ref[...] = (jnp.dot(h_T, wfc_ref[...],
                            preferred_element_type=jnp.float32)
                    + bfc_ref[...]).astype(out_ref.dtype)


def prelstm_forward(x_btd, params):
    """x_btd: (B, T, D) batch_first, like the PyTorch module."""
    B, T, D = x_btd.shape
    H = params["whh_t"].shape[0]
    out_dim = params["w3_t"].shape[1]
    out_pad = pl.cdiv(out_dim, 128) * 128
    Bp = pl.cdiv(max(B, 8), 8) * 8          # sublane-dense (multiple of 8) batch

    # Wrapper-side layout plumbing (negligible at these sizes): time-major,
    # batch zero-padded to Bp rows, flattened into a matmul-ready slab.
    # TODO(synk): at production sizes feed x time-major (or grid Phase 1 over
    # T with an index_map) to avoid this extra strided HBM round trip.
    x_tbd = jnp.transpose(x_btd, (1, 0, 2))
    x_tbd = jnp.pad(x_tbd, ((0, 0), (0, Bp - B), (0, 0)))
    x2d = x_tbd.reshape(T * Bp, D)

    # Fold fc1 -> fc2 -> fc3 into one matmul (no nonlinearities between them);
    # pad the output columns so the kernel's final store is lane-dense.
    w3p = jnp.pad(params["w3_t"], ((0, 0), (0, out_pad - out_dim)))
    b3p = jnp.pad(params["b3"], ((0, 0), (0, out_pad - out_dim)))
    w_fc = params["w1_t"] @ params["w2_t"] @ w3p                     # (H, out_pad)
    b_fc = (params["b1"] @ params["w2_t"] @ w3p
            + params["b2"] @ w3p + b3p)                              # (1, out_pad)

    kernel = functools.partial(prelstm_kernel, T=T, Bp=Bp, H=H)

    out_padded = pl.pallas_call(
        kernel,
        out_shape=jax.ShapeDtypeStruct((Bp, out_pad), jnp.float32),
        scratch_shapes=[pltpu.VMEM((T, Bp, 4 * H), jnp.float32)],
    )(x2d, params["wih_t"], params["whh_t"], params["b_lstm"], w_fc, b_fc)

    # Padded batch rows / output lanes never enter the real outputs.
    return out_padded[:B, :out_dim]


def prelstm_reference(x_btd, params):
    """Pure-JAX reference matching PyTorch nn.LSTM + 3 Linear layers."""
    B, T, D = x_btd.shape
    H = params["whh_t"].shape[0]

    def step(carry, x_t):
        h, c = carry
        gates = x_t @ params["wih_t"] + h @ params["whh_t"] + params["b_lstm"][0]
        i = jax.nn.sigmoid(gates[:, 0 * H:1 * H])
        f = jax.nn.sigmoid(gates[:, 1 * H:2 * H])
        g = jnp.tanh(gates[:, 2 * H:3 * H])
        o = jax.nn.sigmoid(gates[:, 3 * H:4 * H])
        c = f * c + i * g
        h = o * jnp.tanh(c)
        return (h, c), None

    h0 = jnp.zeros((B, H), jnp.float32)
    c0 = jnp.zeros((B, H), jnp.float32)
    (hT, _), _ = jax.lax.scan(step, (h0, c0), jnp.transpose(x_btd, (1, 0, 2)))
    y = hT @ params["w1_t"] + params["b1"][0]
    y = y @ params["w2_t"] + params["b2"][0]
    y = y @ params["w3_t"] + params["b3"][0]
    return y


def make_params(key, input_dim, hidden_dim, output_dim):
    ks = jax.random.split(key, 10)
    s = 0.1
    return {
        # LSTM: stored transposed, (in, 4H) / (H, 4H); biases fused (b_ih+b_hh)
        "wih_t": s * jax.random.normal(ks[0], (input_dim, 4 * hidden_dim), jnp.float32),
        "whh_t": s * jax.random.normal(ks[1], (hidden_dim, 4 * hidden_dim), jnp.float32),
        "b_lstm": s * jax.random.normal(ks[2], (1, 4 * hidden_dim), jnp.float32),
        # fc1 / fc2 / fc3, transposed to (in, out)
        "w1_t": s * jax.random.normal(ks[3], (hidden_dim, 128), jnp.float32),
        "b1":   s * jax.random.normal(ks[4], (1, 128), jnp.float32),
        "w2_t": s * jax.random.normal(ks[5], (128, 128), jnp.float32),
        "b2":   s * jax.random.normal(ks[6], (1, 128), jnp.float32),
        "w3_t": s * jax.random.normal(ks[7], (128, output_dim), jnp.float32),
        "b3":   s * jax.random.normal(ks[8], (1, output_dim), jnp.float32),
    }


if __name__ == "__main__":
    B, T, D = 2, 8, 8          # batch, sequence length, input_dim
    H, OUT = 32, 4             # hidden_dim, output_dim

    key = jax.random.PRNGKey(0)
    k_x, k_p = jax.random.split(key)
    x = jax.random.normal(k_x, (B, T, D), jnp.float32)   # batch_first, like PyTorch
    params = make_params(k_p, D, H, OUT)

    out = prelstm_forward(x, params)
    out = jax.block_until_ready(out)

    ref = prelstm_reference(x, params)
    assert out.shape == (B, OUT)
    # Slightly looser tolerance: folding fc1*fc2*fc3 into one matmul
    # re-associates the f32 accumulation vs. the 3-matmul reference.
    assert jnp.allclose(out, ref, atol=1e-4, rtol=1e-4), "mismatch vs reference"

    print("KERNEL_OK")
</pallas_src>

<mosaic_0001>
module attributes {stable_mosaic.version = 11 : i64} {
  func.func @prelstm_kernel(%arg0: memref<64x8xf32, #tpu.memory_space<vmem>>, %arg1: memref<8x128xf32, #tpu.memory_space<vmem>>, %arg2: memref<32x128xf32, #tpu.memory_space<vmem>>, %arg3: memref<1x128xf32, #tpu.memory_space<vmem>>, %arg4: memref<32x128xf32, #tpu.memory_space<vmem>>, %arg5: memref<1x128xf32, #tpu.memory_space<vmem>>, %arg6: memref<8x128xf32, #tpu.memory_space<vmem>>, %arg7: memref<8x8x128xf32, #tpu.memory_space<vmem>>) attributes {dimension_semantics = [], scalar_prefetch = 0 : i64, scratch_operands = 1 : i64, tpu.core_type = #tpu.core_type<tc>} {
    %c0 = arith.constant 0 : index
    %c0_0 = arith.constant 0 : index
    %0 = vector.load %arg0[%c0, %c0_0] : memref<64x8xf32, #tpu.memory_space<vmem>>, vector<64x8xf32>
    %c0_1 = arith.constant 0 : index
    %c0_2 = arith.constant 0 : index
    %1 = vector.load %arg1[%c0_1, %c0_2] : memref<8x128xf32, #tpu.memory_space<vmem>>, vector<8x128xf32>
    %cst = arith.constant dense<0.000000e+00> : vector<64x128xf32>
    %2 = tpu.matmul %0, %1, %cst {dimension_numbers = #tpu.dot_dimension_numbers<[1], [0], [0], [1], [0, 0, 1, 1], [], []>} : vector<64x8xf32>, vector<8x128xf32>, vector<64x128xf32> -> vector<64x128xf32>
    %c0_3 = arith.constant 0 : index
    %c0_4 = arith.constant 0 : index
    %3 = vector.load %arg3[%c0_3, %c0_4] : memref<1x128xf32, #tpu.memory_space<vmem>>, vector<1x128xf32>
    %4 = vector.broadcast %3 : vector<1x128xf32> to vector<64x128xf32>
    %5 = arith.addf %2, %4 : vector<64x128xf32>
    %6 = vector.shape_cast %5 : vector<64x128xf32> to vector<8x8x128xf32>
    %c0_5 = arith.constant 0 : index
    %c0_6 = arith.constant 0 : index
    %c0_7 = arith.constant 0 : index
    %7 = vector.load %arg7[%c0_5, %c0_6, %c0_7] : memref<8x8x128xf32, #tpu.memory_space<vmem>>, vector<8x8x128xf32>
    tpu.vector_store %arg7[%c0_5, %c0_6, %c0_7], %6 {strides = array<i32>} : memref<8x8x128xf32, #tpu.memory_space<vmem>>, vector<8x8x128xf32>,
    %c0_8 = arith.constant 0 : index
    %c0_9 = arith.constant 0 : index
    %8 = vector.load %arg2[%c0_8, %c0_9] : memref<32x128xf32, #tpu.memory_space<vmem>>, vector<32x128xf32>
    %9 = tpu.iota {dimensions = array<i32: 1>} : vector<8x128xi32>
    %c64_i32 = arith.constant 64 : i32
    %10 = vector.broadcast %c64_i32 : i32 to vector<8x128xi32>
    %11 = arith.cmpi sge, %9, %10 : vector<8x128xi32>
    %c96_i32 = arith.constant 96 : i32
    %12 = vector.broadcast %c96_i32 : i32 to vector<8x128xi32>
    %13 = arith.cmpi slt, %9, %12 : vector<8x128xi32>
    %14 = arith.andi %11, %13 : vector<8x128xi1>
    %cst_10 = arith.constant 0.000000e+00 : f32
    %15 = vector.broadcast %cst_10 : f32 to vector<8x32xf32>
    %cst_11 = arith.constant 0.000000e+00 : f32
    %16 = vector.broadcast %cst_11 : f32 to vector<8x32xf32>
    %c0_i32 = arith.constant 0 : i32
    %17 = arith.index_cast %c0_i32 : i32 to index
    %c0_12 = arith.constant 0 : index
    %c0_13 = arith.constant 0 : index
    %18 = vector.load %arg7[%17, %c0_12, %c0_13] : memref<8x8x128xf32, #tpu.memory_space<vmem>>, vector<1x8x128xf32>
    %19 = vector.shape_cast %18 : vector<1x8x128xf32> to vector<8x128xf32>
    %cst_14 = arith.constant dense<0.000000e+00> : vector<8x128xf32>
    %20 = tpu.matmul %15, %8, %cst_14 {dimension_numbers = #tpu.dot_dimension_numbers<[1], [0], [0], [1], [0, 0, 1, 1], [], []>} : vector<8x32xf32>, vector<32x128xf32>, vector<8x128xf32> -> vector<8x128xf32>
    %21 = arith.addf %19, %20 : vector<8x128xf32>
    %22 = math.tanh %21 : vector<8x128xf32>
    %23 = arith.negf %21 : vector<8x128xf32>
    %24 = math.exp %23 : vector<8x128xf32>
    %cst_15 = arith.constant 1.000000e+00 : f32
    %25 = vector.broadcast %cst_15 : f32 to vector<8x128xf32>
    %26 = arith.addf %25, %24 : vector<8x128xf32>
    %27 = arith.divf %25, %26 : vector<8x128xf32>
    %28 = arith.select %14, %22, %27 : vector<8x128xi1>, vector<8x128xf32>
    %29 = vector.extract_strided_slice %28 {offsets = [0, 0], sizes = [8, 32], strides = [1, 1]} : vector<8x128xf32> to vector<8x32xf32>
    %30 = vector.extract_strided_slice %28 {offsets = [0, 32], sizes = [8, 32], strides = [1, 1]} : vector<8x128xf32> to vector<8x32xf32>
    %31 = vector.extract_strided_slice %28 {offsets = [0, 64], sizes = [8, 32], strides = [1, 1]} : vector<8x128xf32> to vector<8x32xf32>
    %32 = vector.extract_strided_slice %28 {offsets = [0, 96], sizes = [8, 32], strides = [1, 1]} : vector<8x128xf32> to vector<8x32xf32>
    %33 = arith.mulf %30, %16 : vector<8x32xf32>
    %34 = arith.mulf %29, %31 : vector<8x32xf32>
    %35 = arith.addf %33, %34 : vector<8x32xf32>
    %36 = math.tanh %35 : vector<8x32xf32>
    %37 = arith.mulf %32, %36 : vector<8x32xf32>
    %c1_i32 = arith.constant 1 : i32
    %38 = arith.index_cast %c1_i32 : i32 to index
    %c0_16 = arith.constant 0 : index
    %c0_17 = arith.constant 0 : index
    %39 = vector.load %arg7[%38, %c0_16, %c0_17] : memref<8x8x128xf32, #tpu.memory_space<vmem>>, vector<1x8x128xf32>
    %40 = vector.shape_cast %39 : vector<1x8x128xf32> to vector<8x128xf32>
    %cst_18 = arith.constant dense<0.000000e+00> : vector<8x128xf32>
    %41 = tpu.matmul %37, %8, %cst_18 {dimension_numbers = #tpu.dot_dimension_numbers<[1], [0], [0], [1], [0, 0, 1, 1], [], []>} : vector<8x32xf32>, vector<32x128xf32>, vector<8x128xf32> -> vector<8x128xf32>
    %42 = arith.addf %40, %41 : vector<8x128xf32>
    %43 = math.tanh %42 : vector<8x128xf32>
    %44 = arith.negf %42 : vector<8x128xf32>
    %45 = math.exp %44 : vector<8x128xf32>
    %cst_19 = arith.constant 1.000000e+00 : f32
    %46 = vector.broadcast %cst_19 : f32 to vector<8x128xf32>
    %47 = arith.addf %46, %45 : vector<8x128xf32>
    %48 = arith.divf %46, %47 : vector<8x128xf32>
    %49 = arith.select %14, %43, %48 : vector<8x128xi1>, vector<8x128xf32>
    %50 = vector.extract_strided_slice %49 {offsets = [0, 0], sizes = [8, 32], strides = [1, 1]} : vector<8x128xf32> to vector<8x32xf32>
    %51 = vector.extract_strided_slice %49 {offsets = [0, 32], sizes = [8, 32], strides = [1, 1]} : vector<8x128xf32> to vector<8x32xf32>
    %52 = vector.extract_strided_slice %49 {offsets = [0, 64], sizes = [8, 32], strides = [1, 1]} : vector<8x128xf32> to vector<8x32xf32>
    %53 = vector.extract_strided_slice %49 {offsets = [0, 96], sizes = [8, 32], strides = [1, 1]} : vector<8x128xf32> to vector<8x32xf32>
    %54 = arith.mulf %51, %35 : vector<8x32xf32>
    %55 = arith.mulf %50, %52 : vector<8x32xf32>
    %56 = arith.addf %54, %55 : vector<8x32xf32>
    %57 = math.tanh %56 : vector<8x32xf32>
    %58 = arith.mulf %53, %57 : vector<8x32xf32>
    %c2_i32 = arith.constant 2 : i32
    %59 = arith.index_cast %c2_i32 : i32 to index
    %c0_20 = arith.constant 0 : index
    %c0_21 = arith.constant 0 : index
    %60 = vector.load %arg7[%59, %c0_20, %c0_21] : memref<8x8x128xf32, #tpu.memory_space<vmem>>, vector<1x8x128xf32>
    %61 = vector.shape_cast %60 : vector<1x8x128xf32> to vector<8x128xf32>
    %cst_22 = arith.constant dense<0.000000e+00> : vector<8x128xf32>
    %62 = tpu.matmul %58, %8, %cst_22 {dimension_numbers = #tpu.dot_dimension_numbers<[1], [0], [0], [1], [0, 0, 1, 1], [], []>} : vector<8x32xf32>, vector<32x128xf32>, vector<8x128xf32> -> vector<8x128xf32>
    %63 = arith.addf %61, %62 : vector<8x128xf32>
    %64 = math.tanh %63 : vector<8x128xf32>
    %65 = arith.negf %63 : vector<8x128xf32>
    %66 = math.exp %65 : vector<8x128xf32>
    %cst_23 = arith.constant 1.000000e+00 : f32
    %67 = vector.broadcast %cst_23 : f32 to vector<8x128xf32>
    %68 = arith.addf %67, %66 : vector<8x128xf32>
    %69 = arith.divf %67, %68 : vector<8x128xf32>
    %70 = arith.select %14, %64, %69 : vector<8x128xi1>, vector<8x128xf32>
    %71 = vector.extract_strided_slice %70 {offsets = [0, 0], sizes = [8, 32], strides = [1, 1]} : vector<8x128xf32> to vector<8x32xf32>
    %72 = vector.extract_strided_slice %70 {offsets = [0, 32], sizes = [8, 32], strides = [1, 1]} : vector<8x128xf32> to vector<8x32xf32>
    %73 = vector.extract_strided_slice %70 {offsets = [0, 64], sizes = [8, 32], strides = [1, 1]} : vector<8x128xf32> to vector<8x32xf32>
    %74 = vector.extract_strided_slice %70 {offsets = [0, 96], sizes = [8, 32], strides = [1, 1]} : vector<8x128xf32> to vector<8x32xf32>
    %75 = arith.mulf %72, %56 : vector<8x32xf32>
    %76 = arith.mulf %71, %73 : vector<8x32xf32>
    %77 = arith.addf %75, %76 : vector<8x32xf32>
    %78 = math.tanh %77 : vector<8x32xf32>
    %79 = arith.mulf %74, %78 : vector<8x32xf32>
    %c3_i32 = arith.constant 3 : i32
    %80 = arith.index_cast %c3_i32 : i32 to index
    %c0_24 = arith.constant 0 : index
    %c0_25 = arith.constant 0 : index
    %81 = vector.load %arg7[%80, %c0_24, %c0_25] : memref<8x8x128xf32, #tpu.memory_space<vmem>>, vector<1x8x128xf32>
    %82 = vector.shape_cast %81 : vector<1x8x128xf32> to vector<8x128xf32>
    %cst_26 = arith.constant dense<0.000000e+00> : vector<8x128xf32>
    %83 = tpu.matmul %79, %8, %cst_26 {dimension_numbers = #tpu.dot_dimension_numbers<[1], [0], [0], [1], [0, 0, 1, 1], [], []>} : vector<8x32xf32>, vector<32x128xf32>, vector<8x128xf32> -> vector<8x128xf32>
    %84 = arith.addf %82, %83 : vector<8x128xf32>
    %85 = math.tanh %84 : vector<8x128xf32>
    %86 = arith.negf %84 : vector<8x128xf32>
    %87 = math.exp %86 : vector<8x128xf32>
    %cst_27 = arith.constant 1.000000e+00 : f32
    %88 = vector.broadcast %cst_27 : f32 to vector<8x128xf32>
    %89 = arith.addf %88, %87 : vector<8x128xf32>
    %90 = arith.divf %88, %89 : vector<8x128xf32>
    %91 = arith.select %14, %85, %90 : vector<8x128xi1>, vector<8x128xf32>
    %92 = vector.extract_strided_slice %91 {offsets = [0, 0], sizes = [8, 32], strides = [1, 1]} : vector<8x128xf32> to vector<8x32xf32>
    %93 = vector.extract_strided_slice %91 {offsets = [0, 32], sizes = [8, 32], strides = [1, 1]} : vector<8x128xf32> to vector<8x32xf32>
    %94 = vector.extract_strided_slice %91 {offsets = [0, 64], sizes = [8, 32], strides = [1, 1]} : vector<8x128xf32> to vector<8x32xf32>
    %95 = vector.extract_strided_slice %91 {offsets = [0, 96], sizes = [8, 32], strides = [1, 1]} : vector<8x128xf32> to vector<8x32xf32>
    %96 = arith.mulf %93, %77 : vector<8x32xf32>
    %97 = arith.mulf %92, %94 : vector<8x32xf32>
    %98 = arith.addf %96, %97 : vector<8x32xf32>
    %99 = math.tanh %98 : vector<8x32xf32>
    %100 = arith.mulf %95, %99 : vector<8x32xf32>
    %c4_i32 = arith.constant 4 : i32
    %101 = arith.index_cast %c4_i32 : i32 to index
    %c0_28 = arith.constant 0 : index
    %c0_29 = arith.constant 0 : index
    %102 = vector.load %arg7[%101, %c0_28, %c0_29] : memref<8x8x128xf32, #tpu.memory_space<vmem>>, vector<1x8x128xf32>
    %103 = vector.shape_cast %102 : vector<1x8x128xf32> to vector<8x128xf32>
    %cst_30 = arith.constant dense<0.000000e+00> : vector<8x128xf32>
    %104 = tpu.matmul %100, %8, %cst_30 {dimension_numbers = #tpu.dot_dimension_numbers<[1], [0], [0], [1], [0, 0, 1, 1], [], []>} : vector<8x32xf32>, vector<32x128xf32>, vector<8x128xf32> -> vector<8x128xf32>
    %105 = arith.addf %103, %104 : vector<8x128xf32>
    %106 = math.tanh %105 : vector<8x128xf32>
    %107 = arith.negf %105 : vector<8x128xf32>
    %108 = math.exp %107 : vector<8x128xf32>
    %cst_31 = arith.constant 1.000000e+00 : f32
    %109 = vector.broadcast %cst_31 : f32 to vector<8x128xf32>
    %110 = arith.addf %109, %108 : vector<8x128xf32>
    %111 = arith.divf %109, %110 : vector<8x128xf32>
    %112 = arith.select %14, %106, %111 : vector<8x128xi1>, vector<8x128xf32>
    %113 = vector.extract_strided_slice %112 {offsets = [0, 0], sizes = [8, 32], strides = [1, 1]} : vector<8x128xf32> to vector<8x32xf32>
    %114 = vector.extract_strided_slice %112 {offsets = [0, 32], sizes = [8, 32], strides = [1, 1]} : vector<8x128xf32> to vector<8x32xf32>
    %115 = vector.extract_strided_slice %112 {offsets = [0, 64], sizes = [8, 32], strides = [1, 1]} : vector<8x128xf32> to vector<8x32xf32>
    %116 = vector.extract_strided_slice %112 {offsets = [0, 96], sizes = [8, 32], strides = [1, 1]} : vector<8x128xf32> to vector<8x32xf32>
    %117 = arith.mulf %114, %98 : vector<8x32xf32>
    %118 = arith.mulf %113, %115 : vector<8x32xf32>
    %119 = arith.addf %117, %118 : vector<8x32xf32>
    %120 = math.tanh %119 : vector<8x32xf32>
    %121 = arith.mulf %116, %120 : vector<8x32xf32>
    %c5_i32 = arith.constant 5 : i32
    %122 = arith.index_cast %c5_i32 : i32 to index
    %c0_32 = arith.constant 0 : index
    %c0_33 = arith.constant 0 : index
    %123 = vector.load %arg7[%122, %c0_32, %c0_33] : memref<8x8x128xf32, #tpu.memory_space<vmem>>, vector<1x8x128xf32>
    %124 = vector.shape_cast %123 : vector<1x8x128xf32> to vector<8x128xf32>
    %cst_34 = arith.constant dense<0.000000e+00> : vector<8x128xf32>
    %125 = tpu.matmul %121, %8, %cst_34 {dimension_numbers = #tpu.dot_dimension_numbers<[1], [0], [0], [1], [0, 0, 1, 1], [], []>} : vector<8x32xf32>, vector<32x128xf32>, vector<8x128xf32> -> vector<8x128xf32>
    %126 = arith.addf %124, %125 : vector<8x128xf32>
    %127 = math.tanh %126 : vector<8x128xf32>
    %128 = arith.negf %126 : vector<8x128xf32>
    %129 = math.exp %128 : vector<8x128xf32>
    %cst_35 = arith.constant 1.000000e+00 : f32
    %130 = vector.broadcast %cst_35 : f32 to vector<8x128xf32>
    %131 = arith.addf %130, %129 : vector<8x128xf32>
    %132 = arith.divf %130, %131 : vector<8x128xf32>
    %133 = arith.select %14, %127, %132 : vector<8x128xi1>, vector<8x128xf32>
    %134 = vector.extract_strided_slice %133 {offsets = [0, 0], sizes = [8, 32], strides = [1, 1]} : vector<8x128xf32> to vector<8x32xf32>
    %135 = vector.extract_strided_slice %133 {offsets = [0, 32], sizes = [8, 32], strides = [1, 1]} : vector<8x128xf32> to vector<8x32xf32>
    %136 = vector.extract_strided_slice %133 {offsets = [0, 64], sizes = [8, 32], strides = [1, 1]} : vector<8x128xf32> to vector<8x32xf32>
    %137 = vector.extract_strided_slice %133 {offsets = [0, 96], sizes = [8, 32], strides = [1, 1]} : vector<8x128xf32> to vector<8x32xf32>
    %138 = arith.mulf %135, %119 : vector<8x32xf32>
    %139 = arith.mulf %134, %136 : vector<8x32xf32>
    %140 = arith.addf %138, %139 : vector<8x32xf32>
    %141 = math.tanh %140 : vector<8x32xf32>
    %142 = arith.mulf %137, %141 : vector<8x32xf32>
    %c6_i32 = arith.constant 6 : i32
    %143 = arith.index_cast %c6_i32 : i32 to index
    %c0_36 = arith.constant 0 : index
    %c0_37 = arith.constant 0 : index
    %144 = vector.load %arg7[%143, %c0_36, %c0_37] : memref<8x8x128xf32, #tpu.memory_space<vmem>>, vector<1x8x128xf32>
    %145 = vector.shape_cast %144 : vector<1x8x128xf32> to vector<8x128xf32>
    %cst_38 = arith.constant dense<0.000000e+00> : vector<8x128xf32>
    %146 = tpu.matmul %142, %8, %cst_38 {dimension_numbers = #tpu.dot_dimension_numbers<[1], [0], [0], [1], [0, 0, 1, 1], [], []>} : vector<8x32xf32>, vector<32x128xf32>, vector<8x128xf32> -> vector<8x128xf32>
    %147 = arith.addf %145, %146 : vector<8x128xf32>
    %148 = math.tanh %147 : vector<8x128xf32>
    %149 = arith.negf %147 : vector<8x128xf32>
    %150 = math.exp %149 : vector<8x128xf32>
    %cst_39 = arith.constant 1.000000e+00 : f32
    %151 = vector.broadcast %cst_39 : f32 to vector<8x128xf32>
    %152 = arith.addf %151, %150 : vector<8x128xf32>
    %153 = arith.divf %151, %152 : vector<8x128xf32>
    %154 = arith.select %14, %148, %153 : vector<8x128xi1>, vector<8x128xf32>
    %155 = vector.extract_strided_slice %154 {offsets = [0, 0], sizes = [8, 32], strides = [1, 1]} : vector<8x128xf32> to vector<8x32xf32>
    %156 = vector.extract_strided_slice %154 {offsets = [0, 32], sizes = [8, 32], strides = [1, 1]} : vector<8x128xf32> to vector<8x32xf32>
    %157 = vector.extract_strided_slice %154 {offsets = [0, 64], sizes = [8, 32], strides = [1, 1]} : vector<8x128xf32> to vector<8x32xf32>
    %158 = vector.extract_strided_slice %154 {offsets = [0, 96], sizes = [8, 32], strides = [1, 1]} : vector<8x128xf32> to vector<8x32xf32>
    %159 = arith.mulf %156, %140 : vector<8x32xf32>
    %160 = arith.mulf %155, %157 : vector<8x32xf32>
    %161 = arith.addf %159, %160 : vector<8x32xf32>
    %162 = math.tanh %161 : vector<8x32xf32>
    %163 = arith.mulf %158, %162 : vector<8x32xf32>
    %c7_i32 = arith.constant 7 : i32
    %164 = arith.index_cast %c7_i32 : i32 to index
    %c0_40 = arith.constant 0 : index
    %c0_41 = arith.constant 0 : index
    %165 = vector.load %arg7[%164, %c0_40, %c0_41] : memref<8x8x128xf32, #tpu.memory_space<vmem>>, vector<1x8x128xf32>
    %166 = vector.shape_cast %165 : vector<1x8x128xf32> to vector<8x128xf32>
    %cst_42 = arith.constant dense<0.000000e+00> : vector<8x128xf32>
    %167 = tpu.matmul %163, %8, %cst_42 {dimension_numbers = #tpu.dot_dimension_numbers<[1], [0], [0], [1], [0, 0, 1, 1], [], []>} : vector<8x32xf32>, vector<32x128xf32>, vector<8x128xf32> -> vector<8x128xf32>
    %168 = arith.addf %166, %167 : vector<8x128xf32>
    %169 = math.tanh %168 : vector<8x128xf32>
    %170 = arith.negf %168 : vector<8x128xf32>
    %171 = math.exp %170 : vector<8x128xf32>
    %cst_43 = arith.constant 1.000000e+00 : f32
    %172 = vector.broadcast %cst_43 : f32 to vector<8x128xf32>
    %173 = arith.addf %172, %171 : vector<8x128xf32>
    %174 = arith.divf %172, %173 : vector<8x128xf32>
    %175 = arith.select %14, %169, %174 : vector<8x128xi1>, vector<8x128xf32>
    %176 = vector.extract_strided_slice %175 {offsets = [0, 0], sizes = [8, 32], strides = [1, 1]} : vector<8x128xf32> to vector<8x32xf32>
    %177 = vector.extract_strided_slice %175 {offsets = [0, 32], sizes = [8, 32], strides = [1, 1]} : vector<8x128xf32> to vector<8x32xf32>
    %178 = vector.extract_strided_slice %175 {offsets = [0, 64], sizes = [8, 32], strides = [1, 1]} : vector<8x128xf32> to vector<8x32xf32>
    %179 = vector.extract_strided_slice %175 {offsets = [0, 96], sizes = [8, 32], strides = [1, 1]} : vector<8x128xf32> to vector<8x32xf32>
    %180 = arith.mulf %177, %161 : vector<8x32xf32>
    %181 = arith.mulf %176, %178 : vector<8x32xf32>
    %182 = arith.addf %180, %181 : vector<8x32xf32>
    %183 = math.tanh %182 : vector<8x32xf32>
    %184 = arith.mulf %179, %183 : vector<8x32xf32>
    %c8_i32 = arith.constant 8 : i32
    %c0_44 = arith.constant 0 : index
    %c0_45 = arith.constant 0 : index
    %185 = vector.load %arg4[%c0_44, %c0_45] : memref<32x128xf32, #tpu.memory_space<vmem>>, vector<32x128xf32>
    %cst_46 = arith.constant dense<0.000000e+00> : vector<8x128xf32>
    %186 = tpu.matmul %184, %185, %cst_46 {dimension_numbers = #tpu.dot_dimension_numbers<[1], [0], [0], [1], [0, 0, 1, 1], [], []>} : vector<8x32xf32>, vector<32x128xf32>, vector<8x128xf32> -> vector<8x128xf32>
    %c0_47 = arith.constant 0 : index
    %c0_48 = arith.constant 0 : index
    %187 = vector.load %arg5[%c0_47, %c0_48] : memref<1x128xf32, #tpu.memory_space<vmem>>, vector<1x128xf32>
    %188 = vector.broadcast %187 : vector<1x128xf32> to vector<8x128xf32>
    %189 = arith.addf %186, %188 : vector<8x128xf32>
    %c0_49 = arith.constant 0 : index
    %c0_50 = arith.constant 0 : index
    %190 = vector.load %arg6[%c0_49, %c0_50] : memref<8x128xf32, #tpu.memory_space<vmem>>, vector<8x128xf32>
    tpu.vector_store %arg6[%c0_49, %c0_50], %189 {strides = array<i32>} : memref<8x128xf32, #tpu.memory_space<vmem>>, vector<8x128xf32>,
    return
  }
}

</mosaic_0001>

<bundles_post_ra>
// kernel: tpu_custom_call.1
= control target key start
LH: loop header
LB: loop body
LE: loop exit
PB: predicated region body
PF: predicated region fallthrough
CT: control target
= control target key end

     0   :  { %vm40_vm0 = vcmask 64512   ;;  %v1394_v3 = vmov 0.0   ;;  %s1679_s0 = inlined_call_operand.vmem [shape: f32[64,8], index: 0, kind: input, shape index: {}]   ;;  %s1680_s1 = inlined_call_operand.vmem [shape: f32[8,128], index: 1, kind: input, shape index: {}]   ;;  %s1681_s2 = inlined_call_operand.vmem [shape: f32[32,128], index: 2, kind: input, shape index: {}]   ;;  %s1682_s3 = inlined_call_operand.vmem [shape: f32[1,128], index: 3, kind: input, shape index: {}]   ;;  %s1683_s4 = inlined_call_operand.vmem [shape: f32[32,128], index: 4, kind: input, shape index: {}]   ;;  %s1684_s5 = inlined_call_operand.vmem [shape: f32[1,128], index: 5, kind: input, shape index: {}]   ;;  %s1685_s6 = inlined_call_operand.hbm [shape: f32[8,128], index: 6, kind: output, shape index: {}]  }
   0x1   :  { %v32_v0 = vld [vmem:[%s1680_s1] sm:$0xff]  ;;  %v1443_v2 = vld [vmem:[%s1681_s2 + $0x18] sm:$0xff]  ;;  %1204 = vmatprep.subr.mxu1 %v1394_v3  ;;  %v25_v4 = vld [vmem:[%s1679_s0 + $0x8] sm:$0xff] }
   0x2   :  { %v24_v1 = vld [vmem:[%s1679_s0] sm:$0xff]  ;;  %1190 = vmatprep.subr.mxu0 %v32_v0  ;;  %v1453_v5 = vld [vmem:[%s1681_s2 + $0x10] sm:$0xff] }
   0x3   :  { %1191 = vmatpush3.msra.mxu0 %v32_v0  ;;  %1192 = vmatprep.mubr.msk.f32.mxu0 %vm40_vm0, %v24_v1 }
   0x4   :  { %11 = vsyncpa [#allocation4], 0  ;;  %1205 = vmatpush3.msra.mxu1 %v1443_v2  ;;  %1193 = vmatmul.mubr.msk.f32.vlgmr.msra.gmra.mxu0 %vm40_vm0, %v25_v4  ;;  %v1461_v6 = vld [vmem:[%s1681_s2 + $0x8] sm:$0xff]  ;;  %vm1395_vm1 = vmmov 0   ;;  %v1471_v7 = vld [vmem:[%s1681_s2] sm:$0xff]  ;;  %v182_v18 = vlaneseq  ;;  %s1397_s11 = smov 32  }
   0x5   :  { %1206 = vmatprep.subr.mxu1 %v1394_v3  ;;  %1212 = vmatprep.mubr.msk.f32.mxu1 %vm1395_vm1, %v1394_v3  ;;  %v1499_v9 = vld [vmem:[%s1682_s3] ss:$0 sm:$0xff]  ;;  %s1396_s3 = smov 64   ;;  %vm188_vm5 = vcmask 261120   ;;  %v26_v48 = vld [vmem:[%s1679_s0 + $0x10] sm:$0xff]  ;;  %v27_v49 = vld [vmem:[%s1679_s0 + $0x18] sm:$0xff] }
   0x6   :  { %1207 = vmatpush3.msra.mxu1 %v1453_v5  ;;  %1226 = vmatprep.subr.mxu0 %v1394_v3  ;;  %v183_v19 = vand.u32 127, %v182_v18  ;;  %v28_v50 = vld [vmem:[%s1679_s0 + $0x20] sm:$0xff]  ;;  %v29_v51 = vld [vmem:[%s1679_s0 + $0x28] sm:$0xff]  ;;  %v30_v52 = vld [vmem:[%s1679_s0 + $0x30] sm:$0xff]  ;;  %s1398_s8 = smov [#allocation3]  }
   0x7   :  { %1208 = vmatprep.subr.mxu1 %v1394_v3  ;;  %1227 = vmatpush3.msra.mxu0 %v1443_v2  ;;  %v31_v53 = vld [vmem:[%s1679_s0 + $0x38] sm:$0xff]  ;;  %v1010_v20 = vld [vmem:[%s1683_s4 + $0x8] sm:$0xff] }
   0x8   :  { %1209 = vmatpush3.msra.mxu1 %v1461_v6  ;;  %1228 = vmatprep.subr.mxu0 %v1394_v3  ;;  %vm184_vm2 = vcmp.ge.s32.totalorder %v183_v19, 64  ;;  %vm185_vm3 = vcmp.lt.s32.totalorder %v183_v19, 96 }
   0x9   :  { %1210 = vmatprep.subr.mxu1 %v1394_v3  ;;  %1229 = vmatpush3.msra.mxu0 %v1453_v5  ;;  %vm1502_vm4 = vmand %vm184_vm2, %vm185_vm3 }
   0xa   :  { %1211 = vmatpush3.msra.mxu1 %v1471_v7  ;;  %1230 = vmatprep.subr.mxu0 %v1394_v3 }
   0xb   :  { %1213 = vmatmul.mubr.f32.vlgmr.msra.gmra.mxu1 %v1394_v3  ;;  %1215 = vmatprep.subr.mxu1 %v1394_v3 }
   0xc   :  { %1216 = vmatpush3.msra.mxu1 %v1443_v2  ;;  %1223 = vmatprep.mubr.msk.f32.mxu1 %vm1395_vm1, %v1394_v3 }
   0xd   :  { %1217 = vmatprep.subr.mxu1 %v1394_v3  ;;  %1231 = vmatpush3.msra.mxu0 %v1461_v6 }
   0xe   :  { %1218 = vmatpush3.msra.mxu1 %v1453_v5  ;;  %1232 = vmatprep.subr.mxu0 %v1394_v3 }
   0xf   :  { %1219 = vmatprep.subr.mxu1 %v1394_v3  ;;  %1233 = vmatpush3.msra.mxu0 %v1471_v7 }
  0x10   :  { %1220 = vmatpush3.msra.mxu1 %v1461_v6  ;;  %1248 = vmatprep.subr.mxu0 %v1394_v3 }
  0x11   :  { %1221 = vmatprep.subr.mxu1 %v1394_v3  ;;  %1195 = vmatprep.mubr.msk.f32.mxu0 %vm40_vm0, %v26_v48 }
  0x12   :  { %1222 = vmatpush3.msra.mxu1 %v1471_v7  ;;  %1196 = vmatmul.mubr.msk.f32.gmra.mxu0 %vm40_vm0, %v27_v49 }
  0x13   :  { %1237 = vmatprep.subr.mxu1 %v1394_v3  ;;  %1198 = vmatprep.mubr.msk.f32.mxu0 %vm40_vm0, %v28_v50 }
  0x16   :  { %1199 = vmatmul.mubr.msk.f32.gmra.mxu0 %vm40_vm0, %v29_v51 }
  0x17   :  { %1201 = vmatprep.mubr.msk.f32.mxu0 %vm40_vm0, %v30_v52 }
  0x1a   :  { %1202 = vmatmul.mubr.msk.f32.gmra.mxu0 %vm40_vm0, %v31_v53 }
  0x1b   :  { %1234 = vmatprep.mubr.msk.f32.mxu0 %vm1395_vm1, %v1394_v3 }
  0xc4   :  { %v1194_v8 = vpop.f32.mrf.mxu0 }
  0xc5   :  { %v137_v33 = vadd.f32 %v1194_v8, %v1499_v9 }
  0xc6   :  { %v131_v10 = vpop.f32.mrf.mxu0 }
  0xc7   :  { %v132_v11 = vadd.f32 %v1499_v9, %v131_v10 }
  0xcb   :  { %v258_v12 = vpop.f32.mrf.mxu1 }
  0xcc   :  { %v262_v13 = vadd.f32 %v258_v12, %v132_v11 }
  0xcd   :  { %v1214_v14 = vpop.f32.mrf.mxu1 }
  0xce   :  { %v1119_v15 = vmul.f32 -1.442695, %v262_v13 }
  0xd0   :  { %1308 = vpow2.f32 %v1119_v15 }
  0xd1   :  { %1310 = vtanh.f32 %v262_v13 }
  0xd2   :  { %v1197_v58 = vpop.f32.mrf.mxu0 }
  0xd4   :  { %v141_v59 = vpop.f32.mrf.mxu0 }
  0xd5   :  { %v142_v0 = vadd.f32 %v1499_v9, %v141_v59 }
  0xd6   :  { %v1567_v60 = vpop.f32.mrf.mxu0 }
  0xd8   :  { %v1569_v61 = vpop.f32.mrf.mxu0 }
  0xda   :  { %v1571_v62 = vpop.f32.mrf.mxu0 }
  0xdc   :  { %v1573_v63 = vpop.f32.mrf.mxu0 }
  0xdd   :  { %v1309_v16 = vpop.eup %1308 }
  0xde   :  { %v267_v17 = vadd.f32 1.0, %v1309_v16  ;;  %v1311_v21 = vpop.eup %1310 }
  0xe0   :  { %1312 = vrcp.f32 %v267_v17 }
  0xed   :  { %v1313_v22 = vpop.eup %1312 }
  0xee   :  { %v270_v23 = vsel %vm1502_vm4, %v1311_v21, %v1313_v22 }
  0xef   :  { %273 = vrot.lane.b32.xlu0 %v270_v23, %s1396_s3  ;;  %v271_v26 = vmul.f32 0.0, %v270_v23 }
 0x161   :  { %v274_v24 = vpop.permute.xlu0 %273 }
 0x162   :  { %v276_v25 = vmul.f32 %v274_v24, %v270_v23 }
 0x164   :  { %278 = vrot.lane.b32.xlu0 %v276_v25, %s1397_s11 }
 0x1d6   :  { %v279_v27 = vpop.permute.xlu0 %278 }
 0x1d7   :  { %v281_v28 = vadd.f32 %v279_v27, %v271_v26  ;;  %v147_v26 = vadd.f32 %v1197_v58, %v1499_v9 }
 0x1d9   :  { %1314 = vtanh.f32 %v281_v28 }
 0x1e6   :  { %v1315_v29 = vpop.eup %1314 }
 0x1e7   :  { %284 = vrot.lane.b32.xlu1 %v1315_v29, %s1396_s3 }
 0x259   :  { %v285_v30 = vpop.permute.xlu1 %284 }
 0x25a   :  { %v287_v31 = vmul.f32 %v285_v30, %v270_v23 }
 0x25c   :  { %291 = vrot.lane.b32.xlu1 %v287_v31, %s1397_s11 }
 0x2ce   :  { %v292_v32 = vpop.permute.xlu1 %291 }
 0x2cf   :  { %1224 = vmatmul.mubr.msk.f32.vlgmr.msra.gmra.mxu1 %vm188_vm5, %v292_v32 }
 0x2d0   :  { %1238 = vmatpush3.msra.mxu1 %v1443_v2  ;;  %1245 = vmatprep.mubr.msk.f32.mxu1 %vm1395_vm1, %v1394_v3 }
 0x2d1   :  { %1239 = vmatprep.subr.mxu1 %v1394_v3 }
 0x2d2   :  { %1240 = vmatpush3.msra.mxu1 %v1453_v5 }
 0x2d3   :  { %1241 = vmatprep.subr.mxu1 %v1394_v3 }
 0x2d4   :  { %1242 = vmatpush3.msra.mxu1 %v1461_v6 }
 0x2d5   :  { %1243 = vmatprep.subr.mxu1 %v1394_v3 }
 0x2d6   :  { %1244 = vmatpush3.msra.mxu1 %v1471_v7 }
 0x2d7   :  { %1259 = vmatprep.subr.mxu1 %v1394_v3 }
 0x38f   :  { %v361_v34 = vpop.f32.mrf.mxu1 }
 0x390   :  { %v365_v35 = vadd.f32 %v361_v34, %v137_v33 }
 0x391   :  { %v1225_v36 = vpop.f32.mrf.mxu1 }
 0x392   :  { %v1121_v37 = vmul.f32 -1.442695, %v365_v35 }
 0x394   :  { %1316 = vpow2.f32 %v1121_v37 }
 0x395   :  { %1318 = vtanh.f32 %v365_v35 }
 0x3a1   :  { %v1317_v38 = vpop.eup %1316 }
 0x3a2   :  { %v370_v39 = vadd.f32 1.0, %v1317_v38  ;;  %v1319_v40 = vpop.eup %1318 }
 0x3a4   :  { %1320 = vrcp.f32 %v370_v39 }
 0x3b1   :  { %v1321_v41 = vpop.eup %1320 }
 0x3b2   :  { %v373_v42 = vsel %vm1502_vm4, %v1319_v40, %v1321_v41 }
 0x3b3   :  { %376 = vrot.lane.b32.xlu0 %v373_v42, %s1396_s3  ;;  %v374_v45 = vmul.f32 %v373_v42, %v281_v28 }
 0x425   :  { %v377_v43 = vpop.permute.xlu0 %376 }
 0x426   :  { %v379_v44 = vmul.f32 %v377_v43, %v373_v42 }
 0x428   :  { %381 = vrot.lane.b32.xlu1 %v379_v44, %s1397_s11 }
 0x49a   :  { %v382_v46 = vpop.permute.xlu1 %381 }
 0x49b   :  { %v384_v47 = vadd.f32 %v382_v46, %v374_v45  ;;  %v152_v45 = vadd.f32 %v1499_v9, %v1569_v61 }
 0x49d   :  { %1322 = vtanh.f32 %v384_v47 }
 0x4aa   :  { %v1323_v54 = vpop.eup %1322 }
 0x4ab   :  { %387 = vrot.lane.b32.xlu0 %v1323_v54, %s1396_s3 }
 0x51d   :  { %v388_v55 = vpop.permute.xlu0 %387 }
 0x51e   :  { %v390_v56 = vmul.f32 %v388_v55, %v373_v42 }
 0x520   :  { %394 = vrot.lane.b32.xlu1 %v390_v56, %s1397_s11 }
 0x592   :  { %v395_v57 = vpop.permute.xlu1 %394 }
 0x593   :  { %1235 = vmatmul.mubr.msk.f32.vlgmr.msra.gmra.mxu0 %vm188_vm5, %v395_v57 }
 0x594   :  { %1249 = vmatpush3.msra.mxu0 %v1443_v2  ;;  %1256 = vmatprep.mubr.msk.f32.mxu0 %vm1395_vm1, %v1394_v3 }
 0x595   :  { %1250 = vmatprep.subr.mxu0 %v1394_v3 }
 0x596   :  { %1251 = vmatpush3.msra.mxu0 %v1453_v5 }
 0x597   :  { %1252 = vmatprep.subr.mxu0 %v1394_v3 }
 0x598   :  { %1253 = vmatpush3.msra.mxu0 %v1461_v6 }
 0x599   :  { %1254 = vmatprep.subr.mxu0 %v1394_v3 }
 0x59a   :  { %1255 = vmatpush3.msra.mxu0 %v1471_v7 }
 0x59b   :  { %1270 = vmatprep.subr.mxu0 %v1394_v3 }
 0x653   :  { %v464_v1 = vpop.f32.mrf.mxu0 }
 0x654   :  { %v468_v4 = vadd.f32 %v464_v1, %v142_v0 }
 0x655   :  { %v1236_v8 = vpop.f32.mrf.mxu0 }
 0x656   :  { %v1123_v10 = vmul.f32 -1.442695, %v468_v4  ;;  %v157_v8 = vadd.f32 %v1567_v60, %v1499_v9 }
 0x658   :  { %1324 = vpow2.f32 %v1123_v10 }
 0x659   :  { %1326 = vtanh.f32 %v468_v4 }
 0x665   :  { %v1325_v11 = vpop.eup %1324 }
 0x666   :  { %v473_v12 = vadd.f32 1.0, %v1325_v11  ;;  %v1327_v13 = vpop.eup %1326 }
 0x668   :  { %1328 = vrcp.f32 %v473_v12 }
 0x675   :  { %v1329_v14 = vpop.eup %1328 }
 0x676   :  { %v476_v15 = vsel %vm1502_vm4, %v1327_v13, %v1329_v14 }
 0x677   :  { %479 = vrot.lane.b32.xlu0 %v476_v15, %s1396_s3  ;;  %v477_v18 = vmul.f32 %v476_v15, %v384_v47 }
 0x6e9   :  { %v480_v16 = vpop.permute.xlu0 %479 }
 0x6ea   :  { %v482_v17 = vmul.f32 %v480_v16, %v476_v15 }
 0x6ec   :  { %484 = vrot.lane.b32.xlu1 %v482_v17, %s1397_s11 }
 0x75e   :  { %v485_v19 = vpop.permute.xlu1 %484 }
 0x75f   :  { %v487_v21 = vadd.f32 %v485_v19, %v477_v18 }
 0x761   :  { %1330 = vtanh.f32 %v487_v21 }
 0x76e   :  { %v1331_v22 = vpop.eup %1330 }
 0x76f   :  { %490 = vrot.lane.b32.xlu0 %v1331_v22, %s1396_s3 }
 0x7e1   :  { %v491_v23 = vpop.permute.xlu0 %490 }
 0x7e2   :  { %v493_v24 = vmul.f32 %v491_v23, %v476_v15 }
 0x7e4   :  { %497 = vrot.lane.b32.xlu1 %v493_v24, %s1397_s11  ;;  %v162_v24 = vadd.f32 %v1499_v9, %v1573_v63 }
 0x856   :  { %v498_v25 = vpop.permute.xlu1 %497 }
 0x857   :  { %1246 = vmatmul.mubr.msk.f32.vlgmr.msra.gmra.mxu1 %vm188_vm5, %v498_v25 }
 0x858   :  { %1260 = vmatpush3.msra.mxu1 %v1443_v2  ;;  %1267 = vmatprep.mubr.msk.f32.mxu1 %vm1395_vm1, %v1394_v3 }
 0x859   :  { %1261 = vmatprep.subr.mxu1 %v1394_v3 }
 0x85a   :  { %1262 = vmatpush3.msra.mxu1 %v1453_v5 }
 0x85b   :  { %1263 = vmatprep.subr.mxu1 %v1394_v3 }
 0x85c   :  { %1264 = vmatpush3.msra.mxu1 %v1461_v6 }
 0x85d   :  { %1265 = vmatprep.subr.mxu1 %v1394_v3 }
 0x85e   :  { %1266 = vmatpush3.msra.mxu1 %v1471_v7 }
 0x85f   :  { %1281 = vmatprep.subr.mxu1 %v1394_v3 }
 0x917   :  { %v567_v27 = vpop.f32.mrf.mxu1 }
 0x918   :  { %v571_v28 = vadd.f32 %v567_v27, %v147_v26 }
 0x919   :  { %v1247_v29 = vpop.f32.mrf.mxu1 }
 0x91a   :  { %v1125_v30 = vmul.f32 -1.442695, %v571_v28 }
 0x91c   :  { %1332 = vpow2.f32 %v1125_v30 }
 0x91d   :  { %1334 = vtanh.f32 %v571_v28 }
 0x929   :  { %v1333_v31 = vpop.eup %1332 }
 0x92a   :  { %v576_v32 = vadd.f32 1.0, %v1333_v31  ;;  %v1335_v33 = vpop.eup %1334 }
 0x92c   :  { %1336 = vrcp.f32 %v576_v32 }
 0x939   :  { %v1337_v34 = vpop.eup %1336 }
 0x93a   :  { %v579_v35 = vsel %vm1502_vm4, %v1335_v33, %v1337_v34 }
 0x93b   :  { %582 = vrot.lane.b32.xlu0 %v579_v35, %s1396_s3  ;;  %v580_v38 = vmul.f32 %v579_v35, %v487_v21 }
 0x9ad   :  { %v583_v36 = vpop.permute.xlu0 %582 }
 0x9ae   :  { %v585_v37 = vmul.f32 %v583_v36, %v579_v35 }
 0x9b0   :  { %587 = vrot.lane.b32.xlu1 %v585_v37, %s1397_s11 }
 0xa22   :  { %v588_v39 = vpop.permute.xlu1 %587 }
 0xa23   :  { %v590_v40 = vadd.f32 %v588_v39, %v580_v38 }
 0xa25   :  { %1338 = vtanh.f32 %v590_v40 }
 0xa32   :  { %v1339_v41 = vpop.eup %1338 }
 0xa33   :  { %593 = vrot.lane.b32.xlu0 %v1339_v41, %s1396_s3 }
 0xaa5   :  { %v594_v42 = vpop.permute.xlu0 %593 }
 0xaa6   :  { %v596_v43 = vmul.f32 %v594_v42, %v579_v35  ;;  %v167_v42 = vadd.f32 %v1571_v62, %v1499_v9 }
 0xaa8   :  { %600 = vrot.lane.b32.xlu1 %v596_v43, %s1397_s11 }
 0xb1a   :  { %v601_v44 = vpop.permute.xlu1 %600 }
 0xb1b   :  { %1257 = vmatmul.mubr.msk.f32.vlgmr.msra.gmra.mxu0 %vm188_vm5, %v601_v44 }
 0xb1c   :  { %1271 = vmatpush3.msra.mxu0 %v1443_v2  ;;  %1278 = vmatprep.mubr.msk.f32.mxu0 %vm1395_vm1, %v1394_v3 }
 0xb1d   :  { %1272 = vmatprep.subr.mxu0 %v1394_v3 }
 0xb1e   :  { %1273 = vmatpush3.msra.mxu0 %v1453_v5 }
 0xb1f   :  { %1274 = vmatprep.subr.mxu0 %v1394_v3 }
 0xb20   :  { %1275 = vmatpush3.msra.mxu0 %v1461_v6 }
 0xb21   :  { %1276 = vmatprep.subr.mxu0 %v1394_v3 }
 0xb22   :  { %1277 = vmatpush3.msra.mxu0 %v1471_v7 }
 0xb23   :  { %1292 = vmatprep.subr.mxu0 %v1394_v3 }
 0xbdb   :  { %v670_v46 = vpop.f32.mrf.mxu0 }
 0xbdc   :  { %v674_v47 = vadd.f32 %v670_v46, %v152_v45 }
 0xbdd   :  { %v1258_v48 = vpop.f32.mrf.mxu0 }
 0xbde   :  { %v1127_v49 = vmul.f32 -1.442695, %v674_v47 }
 0xbe0   :  { %1340 = vpow2.f32 %v1127_v49 }
 0xbe1   :  { %1342 = vtanh.f32 %v674_v47 }
 0xbed   :  { %v1341_v50 = vpop.eup %1340 }
 0xbee   :  { %v679_v51 = vadd.f32 1.0, %v1341_v50  ;;  %v1343_v52 = vpop.eup %1342 }
 0xbf0   :  { %1344 = vrcp.f32 %v679_v51 }
 0xbfd   :  { %v1345_v53 = vpop.eup %1344 }
 0xbfe   :  { %v682_v54 = vsel %vm1502_vm4, %v1343_v52, %v1345_v53 }
 0xbff   :  { %685 = vrot.lane.b32.xlu0 %v682_v54, %s1396_s3  ;;  %v683_v57 = vmul.f32 %v682_v54, %v590_v40 }
 0xc71   :  { %v686_v55 = vpop.permute.xlu0 %685 }
 0xc72   :  { %v688_v56 = vmul.f32 %v686_v55, %v682_v54  ;;  %v1012_v55 = vld [vmem:[%s1683_s4 + $0x18] sm:$0xff] }
 0xc74   :  { %690 = vrot.lane.b32.xlu1 %v688_v56, %s1397_s11  ;;  %v1011_v56 = vld [vmem:[%s1683_s4 + $0x10] sm:$0xff] }
 0xce6   :  { %v691_v58 = vpop.permute.xlu1 %690 }
 0xce7   :  { %v693_v59 = vadd.f32 %v691_v58, %v683_v57  ;;  %v1009_v57 = vld [vmem:[%s1683_s4] sm:$0xff]  ;;  %s1102_s4 = sshll.u32 %s1398_s8, 4  ;;  %s1103_s4 = int_to_ptr.vmem [resolvable:$true] %s1102_s4 }
 0xce8   :  { %s1372_s9 = scalar_lea.vmem %s1103_s4, 128  ;;  %p1377_p1 = scmp.lt.s32.totalorder %s1103_s4, %s1103_s4 }
 0xce9   :  { %1346 = vtanh.f32 %v693_v59  ;;  %p1373_p0 = scmp.ne.s32.totalorder %s1103_s4, %s1372_s9  ;;  %p1378_p2 = scmp.lt.s32.totalorder %s1372_s9, %s1372_s9 }
 0xceb   :  { %p1379_p3 = por %p1378_p2, %p1377_p1 }
 0xced   :  { %p1380_p4 = pnand %p1379_p3, %p1373_p0 }
 0xcf6   :  { %v1347_v61 = vpop.eup %1346 }
 0xcf7   :  { %696 = vrot.lane.b32.xlu0 %v1347_v61, %s1396_s3 }
 0xd69   :  { %v697_v0 = vpop.permute.xlu0 %696 }
 0xd6a   :  { %v699_v1 = vmul.f32 %v697_v0, %v682_v54 }
 0xd6c   :  { %703 = vrot.lane.b32.xlu1 %v699_v1, %s1397_s11  ;;  %v1134_v1 = vld [vmem:[%s1684_s5] ss:$0 sm:$0xff] }
 0xdde   :  { %v704_v4 = vpop.permute.xlu1 %703 }
 0xddf   :  { %1268 = vmatmul.mubr.msk.f32.vlgmr.msra.gmra.mxu1 %vm188_vm5, %v704_v4 }
 0xde0   :  { %1282 = vmatpush3.msra.mxu1 %v1443_v2  ;;  %1289 = vmatprep.mubr.msk.f32.mxu1 %vm1395_vm1, %v1394_v3 }
 0xde1   :  { %1283 = vmatprep.subr.mxu1 %v1394_v3 }
 0xde2   :  { %1284 = vmatpush3.msra.mxu1 %v1453_v5 }
 0xde3   :  { %1285 = vmatprep.subr.mxu1 %v1394_v3 }
 0xde4   :  { %1286 = vmatpush3.msra.mxu1 %v1461_v6 }
 0xde5   :  { %1287 = vmatprep.subr.mxu1 %v1394_v3 }
 0xde6   :  { %1288 = vmatpush3.msra.mxu1 %v1471_v7 }
 0xe9f   :  { %v773_v10 = vpop.f32.mrf.mxu1 }
 0xea0   :  { %v777_v2 = vadd.f32 %v773_v10, %v157_v8 }
 0xea1   :  { %v1269_v11 = vpop.f32.mrf.mxu1 }
 0xea2   :  { %v1129_v12 = vmul.f32 -1.442695, %v777_v2 }
 0xea4   :  { %1348 = vpow2.f32 %v1129_v12 }
 0xea5   :  { %1350 = vtanh.f32 %v777_v2 }
 0xeb1   :  { %v1349_v13 = vpop.eup %1348 }
 0xeb2   :  { %v782_v14 = vadd.f32 1.0, %v1349_v13  ;;  %v1351_v5 = vpop.eup %1350 }
 0xeb4   :  { %1352 = vrcp.f32 %v782_v14 }
 0xec1   :  { %v1353_v15 = vpop.eup %1352 }
 0xec2   :  { %v785_v6 = vsel %vm1502_vm4, %v1351_v5, %v1353_v15 }
 0xec3   :  { %788 = vrot.lane.b32.xlu0 %v785_v6, %s1396_s3  ;;  %v786_v60 = vmul.f32 %v785_v6, %v693_v59 }
 0xf35   :  { %v789_v7 = vpop.permute.xlu0 %788 }
 0xf36   :  { %v791_v16 = vmul.f32 %v789_v7, %v785_v6 }
 0xf38   :  { %793 = vrot.lane.b32.xlu1 %v791_v16, %s1397_s11 }
 0xfaa   :  { %v794_v17 = vpop.permute.xlu1 %793 }
 0xfab   :  { %v796_v18 = vadd.f32 %v794_v17, %v786_v60 }
 0xfad   :  { %1354 = vtanh.f32 %v796_v18 }
 0xfba   :  { %v1355_v19 = vpop.eup %1354 }
 0xfbb   :  { %799 = vrot.lane.b32.xlu0 %v1355_v19, %s1396_s3 }
0x102d   :  { %v800_v21 = vpop.permute.xlu0 %799 }
0x102e   :  { %v802_v22 = vmul.f32 %v800_v21, %v785_v6 }
0x1030   :  { %806 = vrot.lane.b32.xlu1 %v802_v22, %s1397_s11 }
0x10a2   :  { %v807_v23 = vpop.permute.xlu1 %806 }
0x10a3   :  { %1279 = vmatmul.mubr.msk.f32.vlgmr.msra.gmra.mxu0 %vm188_vm5, %v807_v23 }
0x10a4   :  { %1300 = vmatprep.mubr.msk.f32.mxu0 %vm1395_vm1, %v1394_v3  ;;  %1293 = vmatpush3.msra.mxu0 %v1012_v55 }
0x10a5   :  { %1294 = vmatprep.subr.mxu0 %v1394_v3 }
0x10a6   :  { %1295 = vmatpush3.msra.mxu0 %v1011_v56 }
0x10a7   :  { %1296 = vmatprep.subr.mxu0 %v1394_v3 }
0x10a8   :  { %1297 = vmatpush3.msra.mxu0 %v1010_v20 }
0x10a9   :  { %1298 = vmatprep.subr.mxu0 %v1394_v3 }
0x10aa   :  { %1299 = vmatpush3.msra.mxu0 %v1009_v57 }
0x1163   :  { %v876_v25 = vpop.f32.mrf.mxu0 }
0x1164   :  { %v880_v26 = vadd.f32 %v876_v25, %v162_v24 }
0x1165   :  { %v1280_v27 = vpop.f32.mrf.mxu0 }
0x1166   :  { %v1131_v28 = vmul.f32 -1.442695, %v880_v26 }
0x1168   :  { %1356 = vpow2.f32 %v1131_v28 }
0x1169   :  { %1358 = vtanh.f32 %v880_v26 }
0x1175   :  { %v1357_v29 = vpop.eup %1356 }
0x1176   :  { %v885_v30 = vadd.f32 1.0, %v1357_v29  ;;  %v1359_v31 = vpop.eup %1358 }
0x1178   :  { %1360 = vrcp.f32 %v885_v30 }
0x1185   :  { %v1361_v32 = vpop.eup %1360 }
0x1186   :  { %v888_v33 = vsel %vm1502_vm4, %v1359_v31, %v1361_v32 }
0x1187   :  { %891 = vrot.lane.b32.xlu0 %v888_v33, %s1396_s3  ;;  %v889_v63 = vmul.f32 %v888_v33, %v796_v18 }
0x11f9   :  { %v892_v34 = vpop.permute.xlu0 %891 }
0x11fa   :  { %v894_v35 = vmul.f32 %v892_v34, %v888_v33 }
0x11fc   :  { %896 = vrot.lane.b32.xlu1 %v894_v35, %s1397_s11 }
0x126e   :  { %v897_v36 = vpop.permute.xlu1 %896 }
0x126f   :  { %v899_v37 = vadd.f32 %v897_v36, %v889_v63 }
0x1271   :  { %1362 = vtanh.f32 %v899_v37 }
0x127e   :  { %v1363_v38 = vpop.eup %1362 }
0x127f   :  { %902 = vrot.lane.b32.xlu0 %v1363_v38, %s1396_s3 }
0x12f1   :  { %v903_v39 = vpop.permute.xlu0 %902 }
0x12f2   :  { %v905_v40 = vmul.f32 %v903_v39, %v888_v33 }
0x12f4   :  { %909 = vrot.lane.b32.xlu1 %v905_v40, %s1397_s11 }
0x1366   :  { %v910_v41 = vpop.permute.xlu1 %909 }
0x1367   :  { %1290 = vmatmul.mubr.msk.f32.vlgmr.msra.gmra.mxu1 %vm188_vm5, %v910_v41 }
0x1427   :  { %v979_v43 = vpop.f32.mrf.mxu1 }
0x1428   :  { %v983_v44 = vadd.f32 %v979_v43, %v167_v42 }
0x1429   :  { %v1291_v45 = vpop.f32.mrf.mxu1 }
0x142a   :  { %v1133_v46 = vmul.f32 -1.442695, %v983_v44 }
0x142c   :  { %1364 = vpow2.f32 %v1133_v46 }
0x142d   :  { %1366 = vtanh.f32 %v983_v44 }
0x1439   :  { %v1365_v47 = vpop.eup %1364 }
0x143a   :  { %v988_v48 = vadd.f32 1.0, %v1365_v47  ;;  %v1367_v49 = vpop.eup %1366 }
0x143c   :  { %1368 = vrcp.f32 %v988_v48 }
0x1449   :  { %v1369_v50 = vpop.eup %1368 }
0x144a   :  { %v991_v51 = vsel %vm1502_vm4, %v1367_v49, %v1369_v50 }
0x144b   :  { %994 = vrot.lane.b32.xlu0 %v991_v51, %s1396_s3  ;;  %v992_v9 = vmul.f32 %v991_v51, %v899_v37 }
0x14bd   :  { %v995_v52 = vpop.permute.xlu0 %994 }
0x14be   :  { %v997_v53 = vmul.f32 %v995_v52, %v991_v51 }
0x14c0   :  { %999 = vrot.lane.b32.xlu1 %v997_v53, %s1397_s11 }
0x1532   :  { %v1000_v62 = vpop.permute.xlu1 %999 }
0x1533   :  { %v1002_v54 = vadd.f32 %v1000_v62, %v992_v9 }
0x1535   :  { %1370 = vtanh.f32 %v1002_v54 }
0x1542   :  { %v1371_v58 = vpop.eup %1370 }
0x1543   :  { %1005 = vrot.lane.b32.xlu0 %v1371_v58, %s1396_s3 }
0x15b5   :  { %v1006_v59 = vpop.permute.xlu0 %1005 }
0x15b6   :  { %v1008_v61 = vmul.f32 %v1006_v59, %v991_v51 }
0x15b8   :  { %1021 = vrot.lane.b32.xlu1 %v1008_v61, %s1397_s11 }
0x162a   :  { %v1022_v0 = vpop.permute.xlu1 %1021 }
0x162b   :  { %1301 = vmatmul.mubr.msk.f32.vlgmr.msra.gmra.mxu0 %vm188_vm5, %v1022_v0 }
0x16eb   :  { %v1091_v4 = vpop.f32.mrf.mxu0 }
0x16ec   :  { %v1092_v8 = vadd.f32 %v1134_v1, %v1091_v4 }
0x16ed   :  { %v1302_v3 = vpop.f32.mrf.mxu0 }
0x16ee   :  { %1095 = vst [vmem:[#allocation3] sm:$0xff] %v1092_v8 }
0x16ef   :  { %1383 = shalt.err (!%p1380_p4)
}
0x16f0   :  { %1105 = dma.vmem_to_hbm [thread:$0]  %s1103_s4, 128, %s1685_s6, [#allocation4]  }
0x16f1   :  { %1392 = dma.done.wait [#allocation4], 128  }
0x16f2   :  { %1393 = vsyncadd [#allocation4], 4294967168 }
0x16f3   :  { %1109 = vsyncpa [#allocation4], 1 }

</bundles_post_ra>
